<compile_context>
chip_gen: v7x
topology: tpu7x:2x2x1
jax: 0.10.0
libtpu: 0.0.40
codegen_flags: <defaults>
</compile_context>

<pallas_src>
import functools
import numpy as np
import jax
import jax.numpy as jnp
from jax.experimental import pallas as pl
from jax.experimental.pallas import tpu as pltpu

_LANE = 128


# --------------------------------------------------------------------------------------
# Kernel
# --------------------------------------------------------------------------------------
def _conv_bn_silu_kernel(x_ref, b_ref, shift_ref, o_ref, *, kh_size):
    """One M row-tile per grid step.

    x_ref:     (KH, Mtile, Kpad)   per-kh-tap row-gathered, lane-padded input (bf16/f32)
    b_ref:     (KH, Kpad, Nout)    banded conv weight with BN scale folded in (bf16/f32)
    shift_ref: (1, Nout)           folded BN shift, tiled per output pixel column (f32)
    o_ref:     (Mtile, Nout)       lane-dense output tile
    """
    acc = jnp.zeros(o_ref.shape, jnp.float32)
    # One MXU matmul per kh tap; kw taps + Cin contraction live inside the banded weight.
    for kh in range(kh_size):
        acc += jnp.dot(x_ref[kh], b_ref[kh], preferred_element_type=jnp.float32)
    # Fused BatchNorm (inference; scale folded into weights) + SiLU, kept in f32.
    y = acc + shift_ref[...]
    y = y * jax.nn.sigmoid(y)
    o_ref[...] = y.astype(o_ref.dtype)


# --------------------------------------------------------------------------------------
# One-time parameter preparation (hoisted out of the forward hot path)
# --------------------------------------------------------------------------------------
def prepare_conv_bn_params(weight_oihw, bn_gamma, bn_beta, bn_mean, bn_var, *,
                           input_hw, stride=(1, 1), eps=1e-5,
                           compute_dtype=jnp.bfloat16):
    """Fold inference BN into the conv weights and build the banded (block-Toeplitz over
    width) weight matrix.  Depends only on weights/BN stats and the layer's spatial config,
    so call it once at parameter-load time and reuse (b_mat, shift_row) on every forward.

    Returns:
      b_mat:     (KH, Kpad, Wo*Cout)   compute_dtype
      shift_row: (1, Wo*Cout)          float32
    """
    w_np = np.asarray(weight_oihw, dtype=np.float32)
    gamma = np.asarray(bn_gamma, np.float32)
    beta = np.asarray(bn_beta, np.float32)
    mean = np.asarray(bn_mean, np.float32)
    var = np.asarray(bn_var, np.float32)

    cout, cin, kh, kw = w_np.shape
    h, w = input_hw
    sh, sw = stride
    ph, pw = (kh - 1) // 2, (kw - 1) // 2
    wo = (w + 2 * pw - kw) // sw + 1
    wp = w + 2 * pw
    k_dim = wp * cin
    k_pad = -(-k_dim // _LANE) * _LANE            # pad contraction dim to lane-dense 128
    n_out = wo * cout

    scale = gamma / np.sqrt(var + eps)
    shift = beta - mean * scale
    w_fold = w_np * scale[:, None, None, None]    # (Cout, Cin, KH, KW), BN scale folded in

    # B[kh, p*Cin+ci, v*Cout+co] = w_fold[co, ci, kh, p - v*sw]  when 0 <= p - v*sw < KW
    band = np.zeros((kh, wp, cin, wo, cout), np.float32)
    for k_h in range(kh):
        for k_w in range(kw):
            for v in range(wo):
                p = v * sw + k_w
                band[k_h, p, :, v, :] += w_fold[:, :, k_h, k_w].T      # (Cin, Cout)
    b_mat = np.zeros((kh, k_pad, n_out), np.float32)
    b_mat[:, :k_dim, :] = band.reshape(kh, k_dim, n_out)

    shift_row = np.tile(shift, wo).reshape(1, n_out)

    return (jnp.asarray(b_mat, dtype=compute_dtype),
            jnp.asarray(shift_row, dtype=jnp.float32))


# --------------------------------------------------------------------------------------
# Forward (one fused jit region around the pallas_call)
# --------------------------------------------------------------------------------------
def _default_num_m_tiles(m_total):
    """Single grid step on single-TC v5e/v6e; 2-way parallel grid on dual-TC v7x."""
    try:
        kind = jax.devices()[0].device_kind.lower()
    except Exception:
        kind = ""
    tiles = 2 if "v7" in kind else 1
    while tiles > 1 and (m_total % tiles != 0 or (m_total // tiles) % 8 != 0):
        tiles -= 1
    return max(tiles, 1)


@functools.partial(jax.jit,
                   static_argnames=("kernel_size", "stride", "out_channels", "num_m_tiles"))
def _forward(x_nchw, b_mat, shift_row, *, kernel_size, stride, out_channels, num_m_tiles):
    n, cin, h, w = x_nchw.shape
    kh, kw = kernel_size
    sh, sw = stride
    ph, pw = (kh - 1) // 2, (kw - 1) // 2
    ho = (h + 2 * ph - kh) // sh + 1
    wo = (w + 2 * pw - kw) // sw + 1
    hp = h + 2 * ph
    k_pad = b_mat.shape[1]
    n_out = b_mat.shape[2]
    cout = out_channels
    assert n_out == wo * cout, (n_out, wo, cout)

    # Lane-dense packing: channels-last, (W*Cin) on the 128-lane axis, zero-padded to Kpad.
    x_nhwc = jnp.transpose(x_nchw, (0, 2, 3, 1))
    x_pad = jnp.pad(x_nhwc, ((0, 0), (ph, ph), (pw, pw), (0, 0)))
    x_packed = x_pad.reshape(n, hp, (w + 2 * pw) * cin)
    x_packed = jnp.pad(x_packed, ((0, 0), (0, 0), (0, k_pad - x_packed.shape[-1])))

    # Pre-select the rows for each kh tap in the wrapper (fused under jit).  This folds the
    # batch into the matmul M dimension and removes any (possibly strided) sublane slicing
    # from the kernel body — also the clean path for stride=2 downsampling convs.
    taps = [x_packed[:, k: k + (ho - 1) * sh + 1: sh, :].reshape(n * ho, k_pad)
            for k in range(kh)]
    x_taps = jnp.stack(taps, axis=0).astype(b_mat.dtype)         # (KH, N*Ho, Kpad)

    m_total = n * ho
    m_tile = m_total // num_m_tiles

    kernel = functools.partial(_conv_bn_silu_kernel, kh_size=kh)
    out_packed = pl.pallas_call(
        kernel,
        out_shape=jax.ShapeDtypeStruct((m_total, n_out), x_nchw.dtype),
        grid_spec=pltpu.PrefetchScalarGridSpec(
            num_scalar_prefetch=0,
            grid=(num_m_tiles,),
            in_specs=[
                pl.BlockSpec((kh, m_tile, k_pad), lambda i: (0, i, 0)),
                pl.BlockSpec((kh, k_pad, n_out), lambda i: (0, 0, 0)),
                pl.BlockSpec((1, n_out), lambda i: (0, 0)),
            ],
            out_specs=pl.BlockSpec((m_tile, n_out), lambda i: (i, 0)),
        ),
        compiler_params=pltpu.CompilerParams(
            dimension_semantics=("parallel",)),
    )(x_taps, b_mat, shift_row)

    # (N*Ho, Wo*Cout) -> (N, Ho, Wo, Cout) -> NCHW
    return jnp.transpose(out_packed.reshape(n, ho, wo, cout), (0, 3, 1, 2))


def conv_layer_forward(x_nchw, b_mat, shift_row, *, kernel_size, stride,
                       out_channels, num_m_tiles=None):
    """ConvLayer.forward: Conv2d(bias=False) -> BatchNorm2d(inference) -> SiLU.

    x_nchw: (N, Cin, H, W); b_mat/shift_row from prepare_conv_bn_params (called once).
    Returns (N, Cout, Ho, Wo) in NCHW, matching PyTorch.
    """
    n, _, h, _ = x_nchw.shape
    kh = kernel_size[0]
    sh = stride[0]
    ph = (kh - 1) // 2
    ho = (h + 2 * ph - kh) // sh + 1
    if num_m_tiles is None:
        num_m_tiles = _default_num_m_tiles(n * ho)
    return _forward(x_nchw, b_mat, shift_row,
                    kernel_size=tuple(kernel_size), stride=tuple(stride),
                    out_channels=out_channels, num_m_tiles=num_m_tiles)


# --------------------------------------------------------------------------------------
# Pure-JAX reference
# --------------------------------------------------------------------------------------
def _reference(x_nchw, weight_oihw, bn_gamma, bn_beta, bn_mean, bn_var,
               *, stride=(1, 1), eps=1e-5):
    kh, kw = weight_oihw.shape[2], weight_oihw.shape[3]
    ph, pw = (kh - 1) // 2, (kw - 1) // 2
    x_nhwc = jnp.transpose(x_nchw, (0, 2, 3, 1))
    w_hwio = jnp.transpose(weight_oihw, (2, 3, 1, 0))
    y = jax.lax.conv_general_dilated(
        x_nhwc, w_hwio, window_strides=stride,
        padding=((ph, ph), (pw, pw)),
        dimension_numbers=("NHWC", "HWIO", "NHWC"),
        preferred_element_type=jnp.float32)
    scale = bn_gamma / jnp.sqrt(bn_var + eps)
    shift = bn_beta - bn_mean * scale
    y = y * scale + shift
    y = y * jax.nn.sigmoid(y)
    return jnp.transpose(y, (0, 3, 1, 2))


if __name__ == "__main__":
    # Shapes consistent with the module: N=2, Cin=4, H=W=16, Cout=8, k=3.
    N, CIN, H, W = 2, 4, 16, 16
    COUT, KH, KW = 8, 3, 3

    key = jax.random.PRNGKey(0)
    kx, kw_, kg, kb, km, kv = jax.random.split(key, 6)
    x = jax.random.normal(kx, (N, CIN, H, W), dtype=jnp.float32)
    weight = jax.random.normal(kw_, (COUT, CIN, KH, KW), dtype=jnp.float32) * 0.1
    gamma = 1.0 + 0.1 * jax.random.normal(kg, (COUT,), dtype=jnp.float32)
    beta = 0.1 * jax.random.normal(kb, (COUT,), dtype=jnp.float32)
    running_mean = 0.05 * jax.random.normal(km, (COUT,), dtype=jnp.float32)
    running_var = 1.0 + 0.1 * jax.nn.softplus(jax.random.normal(kv, (COUT,), dtype=jnp.float32))

    cases = [
        ((1, 1), jnp.float32, 2e-3, 2e-3),    # stride-1, f32 compute (tight check)
        ((2, 2), jnp.float32, 2e-3, 2e-3),    # stride-2 downsampling conv (tight check)
        ((1, 1), jnp.bfloat16, 2e-2, 2e-2),   # default mixed-precision path (bf16 in, f32 acc)
    ]
    for stride, compute_dtype, rtol, atol in cases:
        # One-time parameter prep (hoisted out of the per-call hot path).
        b_mat, shift_row = prepare_conv_bn_params(
            weight, gamma, beta, running_mean, running_var,
            input_hw=(H, W), stride=stride, compute_dtype=compute_dtype)

        out = jax.block_until_ready(conv_layer_forward(
            x, b_mat, shift_row, kernel_size=(KH, KW), stride=stride, out_channels=COUT))
        ref = jax.block_until_ready(_reference(
            x, weight, gamma, beta, running_mean, running_var, stride=stride))

        assert out.shape == ref.shape, (out.shape, ref.shape)
        np.testing.assert_allclose(np.asarray(out), np.asarray(ref), rtol=rtol, atol=atol)

    print("KERNEL_OK")
</pallas_src>

<mosaic_0001>
module attributes {stable_mosaic.version = 11 : i64} {
  func.func @_conv_bn_silu_kernel(%arg0: i32, %arg1: memref<3x32x128xf32, #tpu.memory_space<vmem>>, %arg2: memref<3x128x128xf32, #tpu.memory_space<vmem>>, %arg3: memref<1x128xf32, #tpu.memory_space<vmem>>, %arg4: memref<32x128xf32, #tpu.memory_space<vmem>>) attributes {dimension_semantics = [#tpu.dimension_semantics<parallel>], iteration_bounds = array<i64: 1>, scalar_prefetch = 0 : i64, scratch_operands = 0 : i64, tpu.core_type = #tpu.core_type<tc>, window_params = [{transform_indices = @transform_0, window_bounds = array<i64: 3, 32, 128>}, {pipeline_mode = #tpu.pipeline_mode<synchronous>, transform_indices = @transform_1, window_bounds = array<i64: 3, 128, 128>}, {pipeline_mode = #tpu.pipeline_mode<synchronous>, transform_indices = @transform_2, window_bounds = array<i64: 1, 128>}, {transform_indices = @transform_3, window_bounds = array<i64: 32, 128>}]} {
    %cst = arith.constant 0.000000e+00 : f32
    %0 = vector.broadcast %cst : f32 to vector<32x128xf32>
    %c0 = arith.constant 0 : index
    %c0_0 = arith.constant 0 : index
    %c0_1 = arith.constant 0 : index
    %1 = vector.load %arg1[%c0, %c0_0, %c0_1] : memref<3x32x128xf32, #tpu.memory_space<vmem>>, vector<1x32x128xf32>
    %2 = vector.shape_cast %1 : vector<1x32x128xf32> to vector<32x128xf32>
    %c0_2 = arith.constant 0 : index
    %c0_3 = arith.constant 0 : index
    %c0_4 = arith.constant 0 : index
    %3 = vector.load %arg2[%c0_2, %c0_3, %c0_4] : memref<3x128x128xf32, #tpu.memory_space<vmem>>, vector<1x128x128xf32>
    %4 = vector.shape_cast %3 : vector<1x128x128xf32> to vector<128x128xf32>
    %cst_5 = arith.constant dense<0.000000e+00> : vector<32x128xf32>
    %5 = tpu.matmul %2, %4, %cst_5 {dimension_numbers = #tpu.dot_dimension_numbers<[1], [0], [0], [1], [0, 0, 1, 1], [], []>} : vector<32x128xf32>, vector<128x128xf32>, vector<32x128xf32> -> vector<32x128xf32>
    %6 = arith.addf %0, %5 : vector<32x128xf32>
    %c1 = arith.constant 1 : index
    %c0_6 = arith.constant 0 : index
    %c0_7 = arith.constant 0 : index
    %7 = vector.load %arg1[%c1, %c0_6, %c0_7] : memref<3x32x128xf32, #tpu.memory_space<vmem>>, vector<1x32x128xf32>
    %8 = vector.shape_cast %7 : vector<1x32x128xf32> to vector<32x128xf32>
    %c1_8 = arith.constant 1 : index
    %c0_9 = arith.constant 0 : index
    %c0_10 = arith.constant 0 : index
    %9 = vector.load %arg2[%c1_8, %c0_9, %c0_10] : memref<3x128x128xf32, #tpu.memory_space<vmem>>, vector<1x128x128xf32>
    %10 = vector.shape_cast %9 : vector<1x128x128xf32> to vector<128x128xf32>
    %cst_11 = arith.constant dense<0.000000e+00> : vector<32x128xf32>
    %11 = tpu.matmul %8, %10, %cst_11 {dimension_numbers = #tpu.dot_dimension_numbers<[1], [0], [0], [1], [0, 0, 1, 1], [], []>} : vector<32x128xf32>, vector<128x128xf32>, vector<32x128xf32> -> vector<32x128xf32>
    %12 = arith.addf %6, %11 : vector<32x128xf32>
    %c2 = arith.constant 2 : index
    %c0_12 = arith.constant 0 : index
    %c0_13 = arith.constant 0 : index
    %13 = vector.load %arg1[%c2, %c0_12, %c0_13] : memref<3x32x128xf32, #tpu.memory_space<vmem>>, vector<1x32x128xf32>
    %14 = vector.shape_cast %13 : vector<1x32x128xf32> to vector<32x128xf32>
    %c2_14 = arith.constant 2 : index
    %c0_15 = arith.constant 0 : index
    %c0_16 = arith.constant 0 : index
    %15 = vector.load %arg2[%c2_14, %c0_15, %c0_16] : memref<3x128x128xf32, #tpu.memory_space<vmem>>, vector<1x128x128xf32>
    %16 = vector.shape_cast %15 : vector<1x128x128xf32> to vector<128x128xf32>
    %cst_17 = arith.constant dense<0.000000e+00> : vector<32x128xf32>
    %17 = tpu.matmul %14, %16, %cst_17 {dimension_numbers = #tpu.dot_dimension_numbers<[1], [0], [0], [1], [0, 0, 1, 1], [], []>} : vector<32x128xf32>, vector<128x128xf32>, vector<32x128xf32> -> vector<32x128xf32>
    %18 = arith.addf %12, %17 : vector<32x128xf32>
    %c0_18 = arith.constant 0 : index
    %c0_19 = arith.constant 0 : index
    %19 = vector.load %arg3[%c0_18, %c0_19] : memref<1x128xf32, #tpu.memory_space<vmem>>, vector<1x128xf32>
    %20 = vector.broadcast %19 : vector<1x128xf32> to vector<32x128xf32>
    %21 = arith.addf %18, %20 : vector<32x128xf32>
    %22 = arith.negf %21 : vector<32x128xf32>
    %23 = math.exp %22 : vector<32x128xf32>
    %cst_20 = arith.constant 1.000000e+00 : f32
    %24 = vector.broadcast %cst_20 : f32 to vector<32x128xf32>
    %25 = arith.addf %24, %23 : vector<32x128xf32>
    %26 = arith.divf %24, %25 : vector<32x128xf32>
    %27 = arith.mulf %21, %26 : vector<32x128xf32>
    %c0_21 = arith.constant 0 : index
    %c0_22 = arith.constant 0 : index
    %28 = vector.load %arg4[%c0_21, %c0_22] : memref<32x128xf32, #tpu.memory_space<vmem>>, vector<32x128xf32>
    tpu.vector_store %arg4[%c0_21, %c0_22], %27 {strides = array<i32>} : memref<32x128xf32, #tpu.memory_space<vmem>>, vector<32x128xf32>,
    return
  }
  func.func @transform_0(%arg0: i32) -> (i32, i32, i32) {
    %c0_i32 = arith.constant 0 : i32
    %c0_i32_0 = arith.constant 0 : i32
    %c0_i32_1 = arith.constant 0 : i32
    return %c0_i32, %arg0, %c0_i32_0 : i32, i32, i32
  }
  func.func @transform_1(%arg0: i32) -> (i32, i32, i32) {
    %c0_i32 = arith.constant 0 : i32
    %c0_i32_0 = arith.constant 0 : i32
    %c0_i32_1 = arith.constant 0 : i32
    %c0_i32_2 = arith.constant 0 : i32
    return %c0_i32, %c0_i32_0, %c0_i32_1 : i32, i32, i32
  }
  func.func @transform_2(%arg0: i32) -> (i32, i32) {
    %c0_i32 = arith.constant 0 : i32
    %c0_i32_0 = arith.constant 0 : i32
    %c0_i32_1 = arith.constant 0 : i32
    return %c0_i32, %c0_i32_0 : i32, i32
  }
  func.func @transform_3(%arg0: i32) -> (i32, i32) {
    %c0_i32 = arith.constant 0 : i32
    %c0_i32_0 = arith.constant 0 : i32
    return %arg0, %c0_i32 : i32, i32
  }
}

</mosaic_0001>

<bundles_post_ra>
// kernel: _forward.1
= control target key start
LH: loop header
LB: loop body
LE: loop exit
PB: predicated region body
PF: predicated region fallthrough
CT: control target
= control target key end

     0   :  { %s954_s1 = inlined_call_operand.vmem [shape: f32[3,128,128], index: 1, kind: input, shape index: {}]   ;;  %s955_s0 = inlined_call_operand.vmem [shape: f32[3,32,128], index: 0, kind: input, shape index: {}]   ;;  %s956_s2 = inlined_call_operand.vmem [shape: f32[1,128], index: 2, kind: input, shape index: {}]   ;;  %s957_s3 = inlined_call_operand.vmem [shape: f32[32,128], index: 3, kind: output, shape index: {}]  }
   0x1   :  { %v388_v0 = vld [vmem:[%s954_s1 + $0x80] sm:$0xff]  ;;  %v389_v1 = vld [vmem:[%s954_s1 + $0x88] sm:$0xff]  ;;  %v390_v5 = vld [vmem:[%s954_s1 + $0x90] sm:$0xff] }
   0x2   :  { %v18_v2 = vld [vmem:[%s954_s1] sm:$0xff]  ;;  %v603_v3 = vpack.c.bf16 %v389_v1, %v388_v0  ;;  %v19_v4 = vld [vmem:[%s954_s1 + $0x8] sm:$0xff]  ;;  %v391_v6 = vld [vmem:[%s954_s1 + $0x98] sm:$0xff] }
   0x3   :  { %v635_v7 = vpack.c.bf16 %v19_v4, %v18_v2  ;;  %v607_v8 = vpack.c.bf16 %v391_v6, %v390_v5  ;;  %v20_v9 = vld [vmem:[%s954_s1 + $0x10] sm:$0xff]  ;;  %v21_v10 = vld [vmem:[%s954_s1 + $0x18] sm:$0xff]  ;;  %v392_v11 = vld [vmem:[%s954_s1 + $0xa0] sm:$0xff] }
   0x4   :  { %604 = vmatprep.subr.bf16.mxu1 %v603_v3  ;;  %v639_v12 = vpack.c.bf16 %v21_v10, %v20_v9  ;;  %v393_v13 = vld [vmem:[%s954_s1 + $0xa8] sm:$0xff]  ;;  %v22_v14 = vld [vmem:[%s954_s1 + $0x20] sm:$0xff]  ;;  %v394_v18 = vld [vmem:[%s954_s1 + $0xb0] sm:$0xff] }
   0x5   :  { %v23_v15 = vld [vmem:[%s954_s1 + $0x28] sm:$0xff]  ;;  %636 = vmatprep.subr.bf16.mxu0 %v635_v7  ;;  %606 = vmatpush3.bf16.msra.mxu1 %v603_v3  ;;  %v611_v16 = vpack.c.bf16 %v393_v13, %v392_v11  ;;  %v395_v19 = vld [vmem:[%s954_s1 + $0xb8] sm:$0xff]  ;;  %v24_v20 = vld [vmem:[%s954_s1 + $0x30] sm:$0xff] }
   0x6   :  { %638 = vmatpush3.bf16.msra.mxu0 %v635_v7  ;;  %608 = vmatprep.subr.bf16.mxu1 %v607_v8  ;;  %v643_v17 = vpack.c.bf16 %v23_v15, %v22_v14  ;;  %v25_v21 = vld [vmem:[%s954_s1 + $0x38] sm:$0xff]  ;;  %v615_v22 = vpack.c.bf16 %v395_v19, %v394_v18  ;;  %v396_v24 = vld [vmem:[%s954_s1 + $0xc0] sm:$0xff]  ;;  %v397_v25 = vld [vmem:[%s954_s1 + $0xc8] sm:$0xff] }
   0x7   :  { %640 = vmatprep.subr.bf16.mxu0 %v639_v12  ;;  %v647_v23 = vpack.c.bf16 %v25_v21, %v24_v20  ;;  %v384_v26 = vld [vmem:[%s955_s0 + $0x20] sm:$0xff]  ;;  %v27_v28 = vld [vmem:[%s954_s1 + $0x48] sm:$0xff]  ;;  %v619_v30 = vpack.c.bf16 %v397_v25, %v396_v24  ;;  %v398_v32 = vld [vmem:[%s954_s1 + $0xd0] sm:$0xff] }
   0x8   :  { %v26_v27 = vld [vmem:[%s954_s1 + $0x40] sm:$0xff]  ;;  %521 = vmatprep.mubr.f32.mxu1 %v384_v26  ;;  %v399_v33 = vld [vmem:[%s954_s1 + $0xd8] sm:$0xff]  ;;  %v28_v34 = vld [vmem:[%s954_s1 + $0x50] sm:$0xff] }
   0x9   :  { %610 = vmatpush3.bf16.msra.mxu1 %v607_v8  ;;  %v14_v29 = vld [vmem:[%s955_s0] sm:$0xff]  ;;  %v651_v31 = vpack.c.bf16 %v27_v28, %v26_v27  ;;  %v29_v35 = vld [vmem:[%s954_s1 + $0x58] sm:$0xff]  ;;  %v623_v36 = vpack.c.bf16 %v399_v33, %v398_v32  ;;  %v401_v39 = vld [vmem:[%s954_s1 + $0xe8] sm:$0xff] }
   0xa   :  { %642 = vmatpush3.bf16.msra.mxu0 %v639_v12  ;;  %612 = vmatprep.subr.bf16.mxu1 %v611_v16  ;;  %v655_v37 = vpack.c.bf16 %v29_v35, %v28_v34  ;;  %v400_v38 = vld [vmem:[%s954_s1 + $0xe0] sm:$0xff]  ;;  %v31_v41 = vld [vmem:[%s954_s1 + $0x68] sm:$0xff]  ;;  %v402_v44 = vld [vmem:[%s954_s1 + $0xf0] sm:$0xff] }
   0xb   :  { %644 = vmatprep.subr.bf16.mxu0 %v643_v17  ;;  %559 = vmatprep.mubr.f32.mxu0 %v14_v29  ;;  %v30_v40 = vld [vmem:[%s954_s1 + $0x60] sm:$0xff]  ;;  %v627_v42 = vpack.c.bf16 %v401_v39, %v400_v38  ;;  %v403_v45 = vld [vmem:[%s954_s1 + $0xf8] sm:$0xff]  ;;  %v32_v46 = vld [vmem:[%s954_s1 + $0x70] sm:$0xff] }
   0xc   :  { %v659_v43 = vpack.c.bf16 %v31_v41, %v30_v40  ;;  %v33_v47 = vld [vmem:[%s954_s1 + $0x78] sm:$0xff]  ;;  %v631_v48 = vpack.c.bf16 %v403_v45, %v402_v44  ;;  %v408_v50 = vld [vmem:[%s954_s1 + $0x100] sm:$0xff]  ;;  %v409_v51 = vld [vmem:[%s954_s1 + $0x108] sm:$0xff] }
   0xd   :  { %614 = vmatpush3.bf16.msra.mxu1 %v611_v16  ;;  %v663_v49 = vpack.c.bf16 %v33_v47, %v32_v46  ;;  %v667_v52 = vpack.c.bf16 %v409_v51, %v408_v50  ;;  %v410_v53 = vld [vmem:[%s954_s1 + $0x110] sm:$0xff]  ;;  %v411_v54 = vld [vmem:[%s954_s1 + $0x118] sm:$0xff]  ;;  %v385_v55 = vld [vmem:[%s955_s0 + $0x28] sm:$0xff] }
   0xe   :  { %646 = vmatpush3.bf16.msra.mxu0 %v643_v17  ;;  %616 = vmatprep.subr.bf16.mxu1 %v615_v22  ;;  %v15_v56 = vld [vmem:[%s955_s0 + $0x8] sm:$0xff]  ;;  %v671_v57 = vpack.c.bf16 %v411_v54, %v410_v53  ;;  %v412_v58 = vld [vmem:[%s954_s1 + $0x120] sm:$0xff]  ;;  %v386_v60 = vld [vmem:[%s955_s0 + $0x30] sm:$0xff] }
   0xf   :  { %648 = vmatprep.subr.bf16.mxu0 %v647_v23  ;;  %v413_v59 = vld [vmem:[%s954_s1 + $0x128] sm:$0xff]  ;;  %v16_v61 = vld [vmem:[%s955_s0 + $0x10] sm:$0xff]  ;;  %v387_v62 = vld [vmem:[%s955_s0 + $0x38] sm:$0xff] }
  0x10   :  { %v675_v63 = vpack.c.bf16 %v413_v59, %v412_v58  ;;  %v17_v0 = vld [vmem:[%s955_s0 + $0x18] sm:$0xff]  ;;  %v414_v1 = vld [vmem:[%s954_s1 + $0x130] sm:$0xff]  ;;  %v404_v3 = vld [vmem:[%s955_s0 + $0x40] sm:$0xff] }
  0x11   :  { %618 = vmatpush3.bf16.msra.mxu1 %v615_v22  ;;  %v415_v2 = vld [vmem:[%s954_s1 + $0x138] sm:$0xff]  ;;  %v406_v4 = vld [vmem:[%s955_s0 + $0x50] sm:$0xff]  ;;  %v416_v6 = vld [vmem:[%s954_s1 + $0x140] sm:$0xff] }
  0x12   :  { %650 = vmatpush3.bf16.msra.mxu0 %v647_v23  ;;  %620 = vmatprep.subr.bf16.mxu1 %v619_v30  ;;  %v679_v5 = vpack.c.bf16 %v415_v2, %v414_v1  ;;  %v417_v7 = vld [vmem:[%s954_s1 + $0x148] sm:$0xff]  ;;  %v418_v9 = vld [vmem:[%s954_s1 + $0x150] sm:$0xff]  ;;  %v419_v10 = vld [vmem:[%s954_s1 + $0x158] sm:$0xff] }
  0x13   :  { %652 = vmatprep.subr.bf16.mxu0 %v651_v31  ;;  %v683_v8 = vpack.c.bf16 %v417_v7, %v416_v6  ;;  %v687_v11 = vpack.c.bf16 %v419_v10, %v418_v9  ;;  %v420_v12 = vld [vmem:[%s954_s1 + $0x160] sm:$0xff]  ;;  %v421_v13 = vld [vmem:[%s954_s1 + $0x168] sm:$0xff]  ;;  %v422_v15 = vld [vmem:[%s954_s1 + $0x170] sm:$0xff] }
  0x14   :  { %v691_v14 = vpack.c.bf16 %v421_v13, %v420_v12  ;;  %v423_v16 = vld [vmem:[%s954_s1 + $0x178] sm:$0xff]  ;;  %v405_v19 = vld [vmem:[%s955_s0 + $0x48] sm:$0xff]  ;;  %v424_v28 = vld [vmem:[%s956_s2] ss:$0 sm:$0xff] }
  0x15   :  { %622 = vmatpush3.bf16.msra.mxu1 %v619_v30  ;;  %v695_v17 = vpack.c.bf16 %v423_v16, %v422_v15  ;;  %v407_v18 = vld [vmem:[%s955_s0 + $0x58] sm:$0xff] }
  0x16   :  { %654 = vmatpush3.bf16.msra.mxu0 %v651_v31  ;;  %624 = vmatprep.subr.bf16.mxu1 %v623_v36 }
  0x17   :  { %656 = vmatprep.subr.bf16.mxu0 %v655_v37 }
  0x19   :  { %626 = vmatpush3.bf16.msra.mxu1 %v623_v36 }
  0x1a   :  { %658 = vmatpush3.bf16.msra.mxu0 %v655_v37  ;;  %628 = vmatprep.subr.bf16.mxu1 %v627_v42 }
  0x1b   :  { %660 = vmatprep.subr.bf16.mxu0 %v659_v43 }
  0x1d   :  { %630 = vmatpush3.bf16.msra.mxu1 %v627_v42 }
  0x1e   :  { %662 = vmatpush3.bf16.msra.mxu0 %v659_v43  ;;  %632 = vmatprep.subr.bf16.mxu1 %v631_v48 }
  0x1f   :  { %664 = vmatprep.subr.bf16.mxu0 %v663_v49 }
  0x21   :  { %634 = vmatpush3.bf16.msra.mxu1 %v631_v48 }
  0x22   :  { %666 = vmatpush3.bf16.msra.mxu0 %v663_v49  ;;  %699 = vmatprep.subr.bf16.mxu1 %v667_v52 }
  0x23   :  { %668 = vmatprep.subr.bf16.mxu0 %v667_v52 }
  0x24   :  { %522 = vmatmul.mubr.f32.vlgmr.msra.gmra.mrb[0].mxu1 %v385_v55 }
  0x25   :  { %560 = vmatmul.mubr.f32.vlgmr.msra.gmra.mrb[0].mxu0 %v15_v56  ;;  %707 = vmatpush3.bf16.msra.mxu1 %v667_v52 }
  0x26   :  { %670 = vmatpush3.bf16.msra.mxu0 %v667_v52  ;;  %700 = vmatprep.subr.bf16.mxu1 %v671_v57 }
  0x27   :  { %672 = vmatprep.subr.bf16.mxu0 %v671_v57  ;;  %524 = vmatprep.mubr.f32.mxu1 %v386_v60 }
  0x28   :  { %562 = vmatprep.mubr.f32.mxu0 %v16_v61  ;;  %525 = vmatmul.mubr.f32.gmra.mrb[2].mxu1 %v387_v62 }
  0x29   :  { %708 = vmatpush3.bf16.msra.mxu1 %v671_v57  ;;  %563 = vmatmul.mubr.f32.gmra.mrb[2].mxu0 %v17_v0 }
  0x2a   :  { %674 = vmatpush3.bf16.msra.mxu0 %v671_v57  ;;  %701 = vmatprep.subr.bf16.mxu1 %v675_v63 }
  0x2b   :  { %676 = vmatprep.subr.bf16.mxu0 %v675_v63  ;;  %597 = vmatprep.mubr.f32.mxu0 %v404_v3 }
  0x2c   :  { %600 = vmatprep.mubr.f32.mxu1 %v406_v4 }
  0x2d   :  { %709 = vmatpush3.bf16.msra.mxu1 %v675_v63 }
  0x2e   :  { %678 = vmatpush3.bf16.msra.mxu0 %v675_v63  ;;  %702 = vmatprep.subr.bf16.mxu1 %v679_v5 }
  0x2f   :  { %680 = vmatprep.subr.bf16.mxu0 %v679_v5 }
  0x31   :  { %710 = vmatpush3.bf16.msra.mxu1 %v679_v5 }
  0x32   :  { %682 = vmatpush3.bf16.msra.mxu0 %v679_v5  ;;  %703 = vmatprep.subr.bf16.mxu1 %v683_v8 }
  0x33   :  { %684 = vmatprep.subr.bf16.mxu0 %v683_v8 }
  0x35   :  { %711 = vmatpush3.bf16.msra.mxu1 %v683_v8 }
  0x36   :  { %686 = vmatpush3.bf16.msra.mxu0 %v683_v8  ;;  %704 = vmatprep.subr.bf16.mxu1 %v687_v11 }
  0x37   :  { %688 = vmatprep.subr.bf16.mxu0 %v687_v11 }
  0x39   :  { %712 = vmatpush3.bf16.msra.mxu1 %v687_v11 }
  0x3a   :  { %690 = vmatpush3.bf16.msra.mxu0 %v687_v11  ;;  %705 = vmatprep.subr.bf16.mxu1 %v691_v14 }
  0x3b   :  { %692 = vmatprep.subr.bf16.mxu0 %v691_v14 }
  0x3d   :  { %713 = vmatpush3.bf16.msra.mxu1 %v691_v14 }
  0x3e   :  { %694 = vmatpush3.bf16.msra.mxu0 %v691_v14  ;;  %706 = vmatprep.subr.bf16.mxu1 %v695_v17 }
  0x3f   :  { %696 = vmatprep.subr.bf16.mxu0 %v695_v17 }
  0x41   :  { %714 = vmatpush3.bf16.msra.mxu1 %v695_v17 }
  0x42   :  { %698 = vmatpush3.bf16.msra.mxu0 %v695_v17 }
  0x44   :  { %601 = vmatmul.mubr.f32.vlgmr.msra.gmra.mrb[4].mxu1 %v407_v18 }
  0x45   :  { %598 = vmatmul.mubr.f32.vlgmr.msra.gmra.mrb[0].mxu0 %v405_v19 }
  0xf7   :  { %v523_v20 = vpop.f32.mrb[0].mxu1 }
  0xf8   :  { %v122_v21 = vpop.f32.mrb[1].mxu1 }
  0xfb   :  { %v526_v22 = vpop.f32.mrb[2].mxu1 }
  0xfc   :  { %v564_v23 = vpop.f32.mrb[2].mxu0  ;;  %v132_v24 = vpop.f32.mrb[3].mxu1 }
  0xfd   :  { %v223_v25 = vadd.f32 %v564_v23, %v526_v22  ;;  %v217_v26 = vpop.f32.mrb[3].mxu0 }
  0xfe   :  { %v218_v27 = vadd.f32 %v217_v26, %v132_v24 }
 0x117   :  { %v602_v29 = vpop.f32.mrb[4].mxu1 }
 0x118   :  { %v599_v30 = vpop.f32.mrb[0].mxu0  ;;  %v336_v31 = vadd.f32 %v602_v29, %v223_v25  ;;  %v324_v32 = vpop.f32.mrb[5].mxu1 }
 0x119   :  { %v715_v33 = vadd.f32 %v599_v30, %v523_v20  ;;  %v314_v34 = vpop.f32.mrb[1].mxu0  ;;  %v335_v35 = vadd.f32 %v324_v32, %v218_v27 }
 0x11a   :  { %v347_v36 = vadd.f32 %v424_v28, %v336_v31  ;;  %v716_v37 = vadd.f32 %v314_v34, %v122_v21 }
 0x11b   :  { %v345_v38 = vadd.f32 %v715_v33, %v424_v28  ;;  %v346_v39 = vadd.f32 %v424_v28, %v335_v35 }
 0x11c   :  { %v428_v40 = vmul.f32 -1.442695, %v347_v36  ;;  %v344_v41 = vadd.f32 %v716_v37, %v424_v28 }
 0x11d   :  { %v426_v42 = vmul.f32 -1.442695, %v345_v38  ;;  %v427_v43 = vmul.f32 -1.442695, %v346_v39 }
 0x11e   :  { %723 = vpow2.f32 %v428_v40  ;;  %v425_v44 = vmul.f32 -1.442695, %v344_v41 }
 0x11f   :  { %725 = vpow2.f32 %v426_v42 }
 0x120   :  { %727 = vpow2.f32 %v425_v44 }
 0x121   :  { %729 = vpow2.f32 %v427_v43 }
 0x128   :  { %v724_v45 = vpop.eup %723 }
 0x129   :  { %v726_v46 = vpop.eup %725  ;;  %v363_v47 = vadd.f32 1.0, %v724_v45 }
 0x12a   :  { %v728_v48 = vpop.eup %727  ;;  %v361_v49 = vadd.f32 1.0, %v726_v46 }
 0x12b   :  { %v730_v50 = vpop.eup %729  ;;  %731 = vrcp.f32 %v363_v47  ;;  %v360_v51 = vadd.f32 1.0, %v728_v48 }
 0x12c   :  { %733 = vrcp.f32 %v361_v49  ;;  %v362_v52 = vadd.f32 1.0, %v730_v50 }
 0x12d   :  { %735 = vrcp.f32 %v360_v51 }
 0x12e   :  { %737 = vrcp.f32 %v362_v52 }
 0x135   :  { %v732_v53 = vpop.eup %731 }
 0x136   :  { %v734_v54 = vpop.eup %733  ;;  %v375_v55 = vmul.f32 %v732_v53, %v347_v36 }
 0x137   :  { %v736_v56 = vpop.eup %735  ;;  %v373_v57 = vmul.f32 %v734_v54, %v345_v38 }
 0x138   :  { %v738_v58 = vpop.eup %737  ;;  %379 = vst [vmem:[%s957_s3 + $0x18] sm:$0xff] %v375_v55  ;;  %v372_v59 = vmul.f32 %v736_v56, %v344_v41 }
 0x139   :  { %377 = vst [vmem:[%s957_s3 + $0x8] sm:$0xff] %v373_v57  ;;  %v374_v60 = vmul.f32 %v738_v58, %v346_v39 }
 0x13a   :  { %376 = vst [vmem:[%s957_s3] sm:$0xff] %v372_v59 }
 0x13b   :  { %378 = vst [vmem:[%s957_s3 + $0x10] sm:$0xff] %v374_v60 }

</bundles_post_ra>
